<compile_context>
chip_gen: v5e
topology: v5e:2x2
jax: 0.10.0
libtpu: 0.0.40
codegen_flags: <defaults>
</compile_context>

<pallas_src>
import math
import jax
import jax.numpy as jnp
from jax import lax
from jax.experimental import pallas as pl
from jax.experimental.pallas import tpu as pltpu


# ----------------------------- Pallas kernel ------------------------------- #
def _make_kernel(N, OCp, Cp, Mout, Wc):
    def kernel(w_ref, b_ref, x_ref, o_ref):
        # w_ref : (9, OCp, Cp)   per-tap fused conv weights (branches + shortcut)
        # b_ref : (OCp, 1)       fused bias
        # x_ref : (N, Cp, Lin)   zero-padded activations, flat with row stride Wc
        # o_ref : (N, OCp, Mout) lane-dense output (Mout % 128 == 0 here)
        for n in range(N):                       # static unroll (tiny batch)
            acc = jnp.zeros((OCp, Mout), jnp.float32)
            for t in range(9):                   # static unroll over 3x3 taps
                kh, kw = divmod(t, 3)
                off = kh * Wc + kw               # Python int -> static slice
                tap = x_ref[n, :, pl.ds(off, Mout)]          # (Cp, Mout)
                acc = acc + jnp.dot(w_ref[t], tap,
                                    preferred_element_type=jnp.float32)
            o_ref[n] = jnp.maximum(acc + b_ref[...], 0.0)
    return kernel


# ------------------------------ fused forward ------------------------------ #
@jax.jit
def inception_forward(x_nchw, params):
    """Inception forward.  x: (N, C, H, W) float32 -> (N, OC, H, W)."""
    (w1, b1), (w2, b2), (ws, bs) = params
    N, C, H, W = x_nchw.shape
    OC = ws.shape[0]            # total output channels (= 12)
    OC1 = w1.shape[0]           # branch-0 channels (= 4)

    # The algebraic folding assumes this exact geometry (stride=1, dil=1,
    # groups=1, 1x1/3x3 kernels, identical output dims across branches).
    assert w1.shape == (OC1, C, 1, 1), w1.shape
    assert w2.shape == (OC - OC1, C, 3, 3), w2.shape
    assert ws.shape == (OC, C, 3, 3), ws.shape
    assert b1.shape == (OC1,) and b2.shape == (OC - OC1,) and bs.shape == (OC,)

    OCp = ((OC + 7) // 8) * 8          # 12 -> 16 : clean sublane tiling of out
    Cp = ((C + 7) // 8) * 8            # 4  -> 8  : sublane-dense contraction

    # --- fold all three convs + all biases into per-tap (OCp, Cp) matrices ---
    W3 = ws.astype(jnp.float32)                               # shortcut
    W3 = W3.at[OC1:].add(w2.astype(jnp.float32))              # 3x3 branch rows
    W3 = W3.at[:OC1, :, 1, 1].add(w1[:, :, 0, 0])             # 1x1 == center tap
    W3 = jnp.pad(W3, ((0, OCp - OC), (0, Cp - C), (0, 0), (0, 0)))
    w_taps = W3.transpose(2, 3, 0, 1).reshape(9, OCp, Cp)     # tap order (kh,kw)
    b_pad = jnp.pad(bs + jnp.concatenate([b1, b2]),
                    (0, OCp - OC)).reshape(OCp, 1)

    # --- flattened, padded activation layout for the in-kernel im2col ---
    # Row stride Wc >= W+2 chosen so Mout = H*Wc is a multiple of 128 (falls
    # back to W+2 with masked stores if that would blow Wc up).
    Hp = H + 2
    step = 128 // math.gcd(H, 128)
    Wc = (W + 2) if step > 32 else (-(-(W + 2) // step) * step)
    Mout = H * Wc
    Lin = -(-(Hp * Wc + 2) // 128) * 128     # covers max tap offset 2*Wc+2

    x_pad = jnp.pad(x_nchw.astype(jnp.float32),
                    ((0, 0), (0, 0), (1, 1), (1, Wc - W - 1)))  # (N,C,Hp,Wc)
    x_flat = jnp.pad(x_pad.reshape(N, C, Hp * Wc),
                     ((0, 0), (0, Cp - C), (0, Lin - Hp * Wc)))  # (N,Cp,Lin)

    cost = pl.CostEstimate(
        flops=2 * N * 9 * OCp * Cp * Mout,
        transcendentals=0,
        bytes_accessed=4 * (w_taps.size + b_pad.size + x_flat.size
                            + N * OCp * Mout),
    )

    out = pl.pallas_call(
        _make_kernel(N, OCp, Cp, Mout, Wc),
        out_shape=jax.ShapeDtypeStruct((N, OCp, Mout), jnp.float32),
        grid=(1,),                                    # whole problem, one step
        in_specs=[
            pl.BlockSpec((9, OCp, Cp), lambda i: (0, 0, 0)),
            pl.BlockSpec((OCp, 1), lambda i: (0, 0)),
            pl.BlockSpec((N, Cp, Lin), lambda i: (0, 0, 0)),
        ],
        out_specs=pl.BlockSpec((N, OCp, Mout), lambda i: (0, 0, 0)),
        compiler_params=pltpu.CompilerParams(
            dimension_semantics=("arbitrary",)),
        cost_estimate=cost,
    )(w_taps, b_pad, x_flat)

    # (N, OCp, H*Wc) -> (N, OC, H, W): one cheap fused slice+reshape under jit.
    return out[:, :OC, :].reshape(N, OC, H, Wc)[:, :, :, :W]


# --------------------------- reference (lax conv) --------------------------- #
def inception_reference(x, params):
    (w1, b1), (w2, b2), (ws, bs) = params

    def conv(x, w, pad):
        return lax.conv_general_dilated(
            x, w, window_strides=(1, 1), padding=[(pad, pad), (pad, pad)],
            dimension_numbers=("NCHW", "OIHW", "NCHW"))

    y1 = conv(x, w1, 0) + b1[None, :, None, None]
    y2 = conv(x, w2, 1) + b2[None, :, None, None]
    ys = conv(x, ws, 1) + bs[None, :, None, None]
    return jnp.maximum(jnp.concatenate([y1, y2], axis=1) + ys, 0.0)


# --------------------------------- main ------------------------------------ #
if __name__ == "__main__":
    key = jax.random.PRNGKey(0)
    N, C, H, W = 2, 4, 16, 16

    # branch channel math mirrors the module: ceil(C * multiplier)
    oc_b0 = math.ceil(C * 1.0)      # 4
    oc_b1 = math.ceil(C * 2.0)      # 8
    OC = oc_b0 + oc_b1              # 12

    kx, k1, k2, k3, k4, k5, k6 = jax.random.split(key, 7)
    x = jax.random.normal(kx, (N, C, H, W), jnp.float32)

    # deterministic synthetic parameters (PyTorch OIHW layout)
    w1 = jax.random.normal(k1, (oc_b0, C, 1, 1), jnp.float32) * 0.1
    b1 = jax.random.normal(k2, (oc_b0,), jnp.float32) * 0.1
    w2 = jax.random.normal(k3, (oc_b1, C, 3, 3), jnp.float32) * 0.1
    b2 = jax.random.normal(k4, (oc_b1,), jnp.float32) * 0.1
    ws = jax.random.normal(k5, (OC, C, 3, 3), jnp.float32) * 0.1
    bs = jax.random.normal(k6, (OC,), jnp.float32) * 0.1
    params = ((w1, b1), (w2, b2), (ws, bs))

    out = jax.block_until_ready(inception_forward(x, params))
    ref = jax.block_until_ready(inception_reference(x, params))

    assert out.shape == (N, OC, H, W), out.shape
    assert jnp.allclose(out, ref, atol=1e-4, rtol=1e-4), float(
        jnp.max(jnp.abs(out - ref)))

    print("KERNEL_OK")
</pallas_src>

<mosaic_0001>
module attributes {stable_mosaic.version = 11 : i64} {
  func.func @kernel(%arg0: i32, %arg1: memref<9x16x8xf32, #tpu.memory_space<vmem>>, %arg2: memref<16x1xf32, #tpu.memory_space<vmem>>, %arg3: memref<2x8x512xf32, #tpu.memory_space<vmem>>, %arg4: memref<2x16x384xf32, #tpu.memory_space<vmem>>) attributes {dimension_semantics = [#tpu.dimension_semantics<arbitrary>], iteration_bounds = array<i64: 1>, scalar_prefetch = 0 : i64, scratch_operands = 0 : i64, tpu.core_type = #tpu.core_type<tc>, window_params = [{pipeline_mode = #tpu.pipeline_mode<synchronous>, transform_indices = @transform_0, window_bounds = array<i64: 9, 16, 8>}, {pipeline_mode = #tpu.pipeline_mode<synchronous>, transform_indices = @transform_1, window_bounds = array<i64: 16, 1>}, {pipeline_mode = #tpu.pipeline_mode<synchronous>, transform_indices = @transform_2, window_bounds = array<i64: 2, 8, 512>}, {pipeline_mode = #tpu.pipeline_mode<synchronous>, transform_indices = @transform_3, window_bounds = array<i64: 2, 16, 384>}]} {
    %cst = arith.constant 0.000000e+00 : f32
    %0 = vector.broadcast %cst : f32 to vector<16x384xf32>
    %c0 = arith.constant 0 : index
    %c0_0 = arith.constant 0 : index
    %c0_1 = arith.constant 0 : index
    %1 = vector.load %arg3[%c0, %c0_0, %c0_1] : memref<2x8x512xf32, #tpu.memory_space<vmem>>, vector<1x8x384xf32>
    %2 = vector.shape_cast %1 : vector<1x8x384xf32> to vector<8x384xf32>
    %c0_2 = arith.constant 0 : index
    %c0_3 = arith.constant 0 : index
    %c0_4 = arith.constant 0 : index
    %3 = vector.load %arg1[%c0_2, %c0_3, %c0_4] : memref<9x16x8xf32, #tpu.memory_space<vmem>>, vector<1x16x8xf32>
    %4 = vector.shape_cast %3 : vector<1x16x8xf32> to vector<16x8xf32>
    %cst_5 = arith.constant dense<0.000000e+00> : vector<16x384xf32>
    %5 = tpu.matmul %4, %2, %cst_5 {dimension_numbers = #tpu.dot_dimension_numbers<[1], [0], [0], [1], [0, 0, 1, 1], [], []>} : vector<16x8xf32>, vector<8x384xf32>, vector<16x384xf32> -> vector<16x384xf32>
    %6 = arith.addf %0, %5 : vector<16x384xf32>
    %c0_6 = arith.constant 0 : index
    %c0_7 = arith.constant 0 : index
    %c1 = arith.constant 1 : index
    %7 = vector.load %arg3[%c0_6, %c0_7, %c1] : memref<2x8x512xf32, #tpu.memory_space<vmem>>, vector<1x8x384xf32>
    %8 = vector.shape_cast %7 : vector<1x8x384xf32> to vector<8x384xf32>
    %c1_8 = arith.constant 1 : index
    %c0_9 = arith.constant 0 : index
    %c0_10 = arith.constant 0 : index
    %9 = vector.load %arg1[%c1_8, %c0_9, %c0_10] : memref<9x16x8xf32, #tpu.memory_space<vmem>>, vector<1x16x8xf32>
    %10 = vector.shape_cast %9 : vector<1x16x8xf32> to vector<16x8xf32>
    %cst_11 = arith.constant dense<0.000000e+00> : vector<16x384xf32>
    %11 = tpu.matmul %10, %8, %cst_11 {dimension_numbers = #tpu.dot_dimension_numbers<[1], [0], [0], [1], [0, 0, 1, 1], [], []>} : vector<16x8xf32>, vector<8x384xf32>, vector<16x384xf32> -> vector<16x384xf32>
    %12 = arith.addf %6, %11 : vector<16x384xf32>
    %c0_12 = arith.constant 0 : index
    %c0_13 = arith.constant 0 : index
    %c2 = arith.constant 2 : index
    %13 = vector.load %arg3[%c0_12, %c0_13, %c2] : memref<2x8x512xf32, #tpu.memory_space<vmem>>, vector<1x8x384xf32>
    %14 = vector.shape_cast %13 : vector<1x8x384xf32> to vector<8x384xf32>
    %c2_14 = arith.constant 2 : index
    %c0_15 = arith.constant 0 : index
    %c0_16 = arith.constant 0 : index
    %15 = vector.load %arg1[%c2_14, %c0_15, %c0_16] : memref<9x16x8xf32, #tpu.memory_space<vmem>>, vector<1x16x8xf32>
    %16 = vector.shape_cast %15 : vector<1x16x8xf32> to vector<16x8xf32>
    %cst_17 = arith.constant dense<0.000000e+00> : vector<16x384xf32>
    %17 = tpu.matmul %16, %14, %cst_17 {dimension_numbers = #tpu.dot_dimension_numbers<[1], [0], [0], [1], [0, 0, 1, 1], [], []>} : vector<16x8xf32>, vector<8x384xf32>, vector<16x384xf32> -> vector<16x384xf32>
    %18 = arith.addf %12, %17 : vector<16x384xf32>
    %c0_18 = arith.constant 0 : index
    %c0_19 = arith.constant 0 : index
    %c24 = arith.constant 24 : index
    %19 = vector.load %arg3[%c0_18, %c0_19, %c24] : memref<2x8x512xf32, #tpu.memory_space<vmem>>, vector<1x8x384xf32>
    %20 = vector.shape_cast %19 : vector<1x8x384xf32> to vector<8x384xf32>
    %c3 = arith.constant 3 : index
    %c0_20 = arith.constant 0 : index
    %c0_21 = arith.constant 0 : index
    %21 = vector.load %arg1[%c3, %c0_20, %c0_21] : memref<9x16x8xf32, #tpu.memory_space<vmem>>, vector<1x16x8xf32>
    %22 = vector.shape_cast %21 : vector<1x16x8xf32> to vector<16x8xf32>
    %cst_22 = arith.constant dense<0.000000e+00> : vector<16x384xf32>
    %23 = tpu.matmul %22, %20, %cst_22 {dimension_numbers = #tpu.dot_dimension_numbers<[1], [0], [0], [1], [0, 0, 1, 1], [], []>} : vector<16x8xf32>, vector<8x384xf32>, vector<16x384xf32> -> vector<16x384xf32>
    %24 = arith.addf %18, %23 : vector<16x384xf32>
    %c0_23 = arith.constant 0 : index
    %c0_24 = arith.constant 0 : index
    %c25 = arith.constant 25 : index
    %25 = vector.load %arg3[%c0_23, %c0_24, %c25] : memref<2x8x512xf32, #tpu.memory_space<vmem>>, vector<1x8x384xf32>
    %26 = vector.shape_cast %25 : vector<1x8x384xf32> to vector<8x384xf32>
    %c4 = arith.constant 4 : index
    %c0_25 = arith.constant 0 : index
    %c0_26 = arith.constant 0 : index
    %27 = vector.load %arg1[%c4, %c0_25, %c0_26] : memref<9x16x8xf32, #tpu.memory_space<vmem>>, vector<1x16x8xf32>
    %28 = vector.shape_cast %27 : vector<1x16x8xf32> to vector<16x8xf32>
    %cst_27 = arith.constant dense<0.000000e+00> : vector<16x384xf32>
    %29 = tpu.matmul %28, %26, %cst_27 {dimension_numbers = #tpu.dot_dimension_numbers<[1], [0], [0], [1], [0, 0, 1, 1], [], []>} : vector<16x8xf32>, vector<8x384xf32>, vector<16x384xf32> -> vector<16x384xf32>
    %30 = arith.addf %24, %29 : vector<16x384xf32>
    %c0_28 = arith.constant 0 : index
    %c0_29 = arith.constant 0 : index
    %c26 = arith.constant 26 : index
    %31 = vector.load %arg3[%c0_28, %c0_29, %c26] : memref<2x8x512xf32, #tpu.memory_space<vmem>>, vector<1x8x384xf32>
    %32 = vector.shape_cast %31 : vector<1x8x384xf32> to vector<8x384xf32>
    %c5 = arith.constant 5 : index
    %c0_30 = arith.constant 0 : index
    %c0_31 = arith.constant 0 : index
    %33 = vector.load %arg1[%c5, %c0_30, %c0_31] : memref<9x16x8xf32, #tpu.memory_space<vmem>>, vector<1x16x8xf32>
    %34 = vector.shape_cast %33 : vector<1x16x8xf32> to vector<16x8xf32>
    %cst_32 = arith.constant dense<0.000000e+00> : vector<16x384xf32>
    %35 = tpu.matmul %34, %32, %cst_32 {dimension_numbers = #tpu.dot_dimension_numbers<[1], [0], [0], [1], [0, 0, 1, 1], [], []>} : vector<16x8xf32>, vector<8x384xf32>, vector<16x384xf32> -> vector<16x384xf32>
    %36 = arith.addf %30, %35 : vector<16x384xf32>
    %c0_33 = arith.constant 0 : index
    %c0_34 = arith.constant 0 : index
    %c48 = arith.constant 48 : index
    %37 = vector.load %arg3[%c0_33, %c0_34, %c48] : memref<2x8x512xf32, #tpu.memory_space<vmem>>, vector<1x8x384xf32>
    %38 = vector.shape_cast %37 : vector<1x8x384xf32> to vector<8x384xf32>
    %c6 = arith.constant 6 : index
    %c0_35 = arith.constant 0 : index
    %c0_36 = arith.constant 0 : index
    %39 = vector.load %arg1[%c6, %c0_35, %c0_36] : memref<9x16x8xf32, #tpu.memory_space<vmem>>, vector<1x16x8xf32>
    %40 = vector.shape_cast %39 : vector<1x16x8xf32> to vector<16x8xf32>
    %cst_37 = arith.constant dense<0.000000e+00> : vector<16x384xf32>
    %41 = tpu.matmul %40, %38, %cst_37 {dimension_numbers = #tpu.dot_dimension_numbers<[1], [0], [0], [1], [0, 0, 1, 1], [], []>} : vector<16x8xf32>, vector<8x384xf32>, vector<16x384xf32> -> vector<16x384xf32>
    %42 = arith.addf %36, %41 : vector<16x384xf32>
    %c0_38 = arith.constant 0 : index
    %c0_39 = arith.constant 0 : index
    %c49 = arith.constant 49 : index
    %43 = vector.load %arg3[%c0_38, %c0_39, %c49] : memref<2x8x512xf32, #tpu.memory_space<vmem>>, vector<1x8x384xf32>
    %44 = vector.shape_cast %43 : vector<1x8x384xf32> to vector<8x384xf32>
    %c7 = arith.constant 7 : index
    %c0_40 = arith.constant 0 : index
    %c0_41 = arith.constant 0 : index
    %45 = vector.load %arg1[%c7, %c0_40, %c0_41] : memref<9x16x8xf32, #tpu.memory_space<vmem>>, vector<1x16x8xf32>
    %46 = vector.shape_cast %45 : vector<1x16x8xf32> to vector<16x8xf32>
    %cst_42 = arith.constant dense<0.000000e+00> : vector<16x384xf32>
    %47 = tpu.matmul %46, %44, %cst_42 {dimension_numbers = #tpu.dot_dimension_numbers<[1], [0], [0], [1], [0, 0, 1, 1], [], []>} : vector<16x8xf32>, vector<8x384xf32>, vector<16x384xf32> -> vector<16x384xf32>
    %48 = arith.addf %42, %47 : vector<16x384xf32>
    %c0_43 = arith.constant 0 : index
    %c0_44 = arith.constant 0 : index
    %c50 = arith.constant 50 : index
    %49 = vector.load %arg3[%c0_43, %c0_44, %c50] : memref<2x8x512xf32, #tpu.memory_space<vmem>>, vector<1x8x384xf32>
    %50 = vector.shape_cast %49 : vector<1x8x384xf32> to vector<8x384xf32>
    %c8 = arith.constant 8 : index
    %c0_45 = arith.constant 0 : index
    %c0_46 = arith.constant 0 : index
    %51 = vector.load %arg1[%c8, %c0_45, %c0_46] : memref<9x16x8xf32, #tpu.memory_space<vmem>>, vector<1x16x8xf32>
    %52 = vector.shape_cast %51 : vector<1x16x8xf32> to vector<16x8xf32>
    %cst_47 = arith.constant dense<0.000000e+00> : vector<16x384xf32>
    %53 = tpu.matmul %52, %50, %cst_47 {dimension_numbers = #tpu.dot_dimension_numbers<[1], [0], [0], [1], [0, 0, 1, 1], [], []>} : vector<16x8xf32>, vector<8x384xf32>, vector<16x384xf32> -> vector<16x384xf32>
    %54 = arith.addf %48, %53 : vector<16x384xf32>
    %c0_48 = arith.constant 0 : index
    %c0_49 = arith.constant 0 : index
    %55 = vector.load %arg2[%c0_48, %c0_49] : memref<16x1xf32, #tpu.memory_space<vmem>>, vector<16x1xf32>
    %56 = vector.broadcast %55 : vector<16x1xf32> to vector<16x384xf32>
    %57 = arith.addf %54, %56 : vector<16x384xf32>
    %cst_50 = arith.constant 0.000000e+00 : f32
    %58 = vector.broadcast %cst_50 : f32 to vector<16x384xf32>
    %59 = arith.maximumf %57, %58 : vector<16x384xf32>
    %c0_51 = arith.constant 0 : index
    %c0_52 = arith.constant 0 : index
    %c0_53 = arith.constant 0 : index
    %60 = vector.load %arg4[%c0_51, %c0_52, %c0_53] : memref<2x16x384xf32, #tpu.memory_space<vmem>>, vector<1x16x384xf32>
    %61 = vector.shape_cast %60 : vector<1x16x384xf32> to vector<16x384xf32>
    %62 = vector.shape_cast %59 : vector<16x384xf32> to vector<1x16x384xf32>
    tpu.vector_store %arg4[%c0_51, %c0_52, %c0_53], %62 {strides = array<i32>} : memref<2x16x384xf32, #tpu.memory_space<vmem>>, vector<1x16x384xf32>,
    %cst_54 = arith.constant 0.000000e+00 : f32
    %63 = vector.broadcast %cst_54 : f32 to vector<16x384xf32>
    %c1_55 = arith.constant 1 : index
    %c0_56 = arith.constant 0 : index
    %c0_57 = arith.constant 0 : index
    %64 = vector.load %arg3[%c1_55, %c0_56, %c0_57] : memref<2x8x512xf32, #tpu.memory_space<vmem>>, vector<1x8x384xf32>
    %65 = vector.shape_cast %64 : vector<1x8x384xf32> to vector<8x384xf32>
    %c0_58 = arith.constant 0 : index
    %c0_59 = arith.constant 0 : index
    %c0_60 = arith.constant 0 : index
    %66 = vector.load %arg1[%c0_58, %c0_59, %c0_60] : memref<9x16x8xf32, #tpu.memory_space<vmem>>, vector<1x16x8xf32>
    %67 = vector.shape_cast %66 : vector<1x16x8xf32> to vector<16x8xf32>
    %cst_61 = arith.constant dense<0.000000e+00> : vector<16x384xf32>
    %68 = tpu.matmul %67, %65, %cst_61 {dimension_numbers = #tpu.dot_dimension_numbers<[1], [0], [0], [1], [0, 0, 1, 1], [], []>} : vector<16x8xf32>, vector<8x384xf32>, vector<16x384xf32> -> vector<16x384xf32>
    %69 = arith.addf %63, %68 : vector<16x384xf32>
    %c1_62 = arith.constant 1 : index
    %c0_63 = arith.constant 0 : index
    %c1_64 = arith.constant 1 : index
    %70 = vector.load %arg3[%c1_62, %c0_63, %c1_64] : memref<2x8x512xf32, #tpu.memory_space<vmem>>, vector<1x8x384xf32>
    %71 = vector.shape_cast %70 : vector<1x8x384xf32> to vector<8x384xf32>
    %c1_65 = arith.constant 1 : index
    %c0_66 = arith.constant 0 : index
    %c0_67 = arith.constant 0 : index
    %72 = vector.load %arg1[%c1_65, %c0_66, %c0_67] : memref<9x16x8xf32, #tpu.memory_space<vmem>>, vector<1x16x8xf32>
    %73 = vector.shape_cast %72 : vector<1x16x8xf32> to vector<16x8xf32>
    %cst_68 = arith.constant dense<0.000000e+00> : vector<16x384xf32>
    %74 = tpu.matmul %73, %71, %cst_68 {dimension_numbers = #tpu.dot_dimension_numbers<[1], [0], [0], [1], [0, 0, 1, 1], [], []>} : vector<16x8xf32>, vector<8x384xf32>, vector<16x384xf32> -> vector<16x384xf32>
    %75 = arith.addf %69, %74 : vector<16x384xf32>
    %c1_69 = arith.constant 1 : index
    %c0_70 = arith.constant 0 : index
    %c2_71 = arith.constant 2 : index
    %76 = vector.load %arg3[%c1_69, %c0_70, %c2_71] : memref<2x8x512xf32, #tpu.memory_space<vmem>>, vector<1x8x384xf32>
    %77 = vector.shape_cast %76 : vector<1x8x384xf32> to vector<8x384xf32>
    %c2_72 = arith.constant 2 : index
    %c0_73 = arith.constant 0 : index
    %c0_74 = arith.constant 0 : index
    %78 = vector.load %arg1[%c2_72, %c0_73, %c0_74] : memref<9x16x8xf32, #tpu.memory_space<vmem>>, vector<1x16x8xf32>
    %79 = vector.shape_cast %78 : vector<1x16x8xf32> to vector<16x8xf32>
    %cst_75 = arith.constant dense<0.000000e+00> : vector<16x384xf32>
    %80 = tpu.matmul %79, %77, %cst_75 {dimension_numbers = #tpu.dot_dimension_numbers<[1], [0], [0], [1], [0, 0, 1, 1], [], []>} : vector<16x8xf32>, vector<8x384xf32>, vector<16x384xf32> -> vector<16x384xf32>
    %81 = arith.addf %75, %80 : vector<16x384xf32>
    %c1_76 = arith.constant 1 : index
    %c0_77 = arith.constant 0 : index
    %c24_78 = arith.constant 24 : index
    %82 = vector.load %arg3[%c1_76, %c0_77, %c24_78] : memref<2x8x512xf32, #tpu.memory_space<vmem>>, vector<1x8x384xf32>
    %83 = vector.shape_cast %82 : vector<1x8x384xf32> to vector<8x384xf32>
    %c3_79 = arith.constant 3 : index
    %c0_80 = arith.constant 0 : index
    %c0_81 = arith.constant 0 : index
    %84 = vector.load %arg1[%c3_79, %c0_80, %c0_81] : memref<9x16x8xf32, #tpu.memory_space<vmem>>, vector<1x16x8xf32>
    %85 = vector.shape_cast %84 : vector<1x16x8xf32> to vector<16x8xf32>
    %cst_82 = arith.constant dense<0.000000e+00> : vector<16x384xf32>
    %86 = tpu.matmul %85, %83, %cst_82 {dimension_numbers = #tpu.dot_dimension_numbers<[1], [0], [0], [1], [0, 0, 1, 1], [], []>} : vector<16x8xf32>, vector<8x384xf32>, vector<16x384xf32> -> vector<16x384xf32>
    %87 = arith.addf %81, %86 : vector<16x384xf32>
    %c1_83 = arith.constant 1 : index
    %c0_84 = arith.constant 0 : index
    %c25_85 = arith.constant 25 : index
    %88 = vector.load %arg3[%c1_83, %c0_84, %c25_85] : memref<2x8x512xf32, #tpu.memory_space<vmem>>, vector<1x8x384xf32>
    %89 = vector.shape_cast %88 : vector<1x8x384xf32> to vector<8x384xf32>
    %c4_86 = arith.constant 4 : index
    %c0_87 = arith.constant 0 : index
    %c0_88 = arith.constant 0 : index
    %90 = vector.load %arg1[%c4_86, %c0_87, %c0_88] : memref<9x16x8xf32, #tpu.memory_space<vmem>>, vector<1x16x8xf32>
    %91 = vector.shape_cast %90 : vector<1x16x8xf32> to vector<16x8xf32>
    %cst_89 = arith.constant dense<0.000000e+00> : vector<16x384xf32>
    %92 = tpu.matmul %91, %89, %cst_89 {dimension_numbers = #tpu.dot_dimension_numbers<[1], [0], [0], [1], [0, 0, 1, 1], [], []>} : vector<16x8xf32>, vector<8x384xf32>, vector<16x384xf32> -> vector<16x384xf32>
    %93 = arith.addf %87, %92 : vector<16x384xf32>
    %c1_90 = arith.constant 1 : index
    %c0_91 = arith.constant 0 : index
    %c26_92 = arith.constant 26 : index
    %94 = vector.load %arg3[%c1_90, %c0_91, %c26_92] : memref<2x8x512xf32, #tpu.memory_space<vmem>>, vector<1x8x384xf32>
    %95 = vector.shape_cast %94 : vector<1x8x384xf32> to vector<8x384xf32>
    %c5_93 = arith.constant 5 : index
    %c0_94 = arith.constant 0 : index
    %c0_95 = arith.constant 0 : index
    %96 = vector.load %arg1[%c5_93, %c0_94, %c0_95] : memref<9x16x8xf32, #tpu.memory_space<vmem>>, vector<1x16x8xf32>
    %97 = vector.shape_cast %96 : vector<1x16x8xf32> to vector<16x8xf32>
    %cst_96 = arith.constant dense<0.000000e+00> : vector<16x384xf32>
    %98 = tpu.matmul %97, %95, %cst_96 {dimension_numbers = #tpu.dot_dimension_numbers<[1], [0], [0], [1], [0, 0, 1, 1], [], []>} : vector<16x8xf32>, vector<8x384xf32>, vector<16x384xf32> -> vector<16x384xf32>
    %99 = arith.addf %93, %98 : vector<16x384xf32>
    %c1_97 = arith.constant 1 : index
    %c0_98 = arith.constant 0 : index
    %c48_99 = arith.constant 48 : index
    %100 = vector.load %arg3[%c1_97, %c0_98, %c48_99] : memref<2x8x512xf32, #tpu.memory_space<vmem>>, vector<1x8x384xf32>
    %101 = vector.shape_cast %100 : vector<1x8x384xf32> to vector<8x384xf32>
    %c6_100 = arith.constant 6 : index
    %c0_101 = arith.constant 0 : index
    %c0_102 = arith.constant 0 : index
    %102 = vector.load %arg1[%c6_100, %c0_101, %c0_102] : memref<9x16x8xf32, #tpu.memory_space<vmem>>, vector<1x16x8xf32>
    %103 = vector.shape_cast %102 : vector<1x16x8xf32> to vector<16x8xf32>
    %cst_103 = arith.constant dense<0.000000e+00> : vector<16x384xf32>
    %104 = tpu.matmul %103, %101, %cst_103 {dimension_numbers = #tpu.dot_dimension_numbers<[1], [0], [0], [1], [0, 0, 1, 1], [], []>} : vector<16x8xf32>, vector<8x384xf32>, vector<16x384xf32> -> vector<16x384xf32>
    %105 = arith.addf %99, %104 : vector<16x384xf32>
    %c1_104 = arith.constant 1 : index
    %c0_105 = arith.constant 0 : index
    %c49_106 = arith.constant 49 : index
    %106 = vector.load %arg3[%c1_104, %c0_105, %c49_106] : memref<2x8x512xf32, #tpu.memory_space<vmem>>, vector<1x8x384xf32>
    %107 = vector.shape_cast %106 : vector<1x8x384xf32> to vector<8x384xf32>
    %c7_107 = arith.constant 7 : index
    %c0_108 = arith.constant 0 : index
    %c0_109 = arith.constant 0 : index
    %108 = vector.load %arg1[%c7_107, %c0_108, %c0_109] : memref<9x16x8xf32, #tpu.memory_space<vmem>>, vector<1x16x8xf32>
    %109 = vector.shape_cast %108 : vector<1x16x8xf32> to vector<16x8xf32>
    %cst_110 = arith.constant dense<0.000000e+00> : vector<16x384xf32>
    %110 = tpu.matmul %109, %107, %cst_110 {dimension_numbers = #tpu.dot_dimension_numbers<[1], [0], [0], [1], [0, 0, 1, 1], [], []>} : vector<16x8xf32>, vector<8x384xf32>, vector<16x384xf32> -> vector<16x384xf32>
    %111 = arith.addf %105, %110 : vector<16x384xf32>
    %c1_111 = arith.constant 1 : index
    %c0_112 = arith.constant 0 : index
    %c50_113 = arith.constant 50 : index
    %112 = vector.load %arg3[%c1_111, %c0_112, %c50_113] : memref<2x8x512xf32, #tpu.memory_space<vmem>>, vector<1x8x384xf32>
    %113 = vector.shape_cast %112 : vector<1x8x384xf32> to vector<8x384xf32>
    %c8_114 = arith.constant 8 : index
    %c0_115 = arith.constant 0 : index
    %c0_116 = arith.constant 0 : index
    %114 = vector.load %arg1[%c8_114, %c0_115, %c0_116] : memref<9x16x8xf32, #tpu.memory_space<vmem>>, vector<1x16x8xf32>
    %115 = vector.shape_cast %114 : vector<1x16x8xf32> to vector<16x8xf32>
    %cst_117 = arith.constant dense<0.000000e+00> : vector<16x384xf32>
    %116 = tpu.matmul %115, %113, %cst_117 {dimension_numbers = #tpu.dot_dimension_numbers<[1], [0], [0], [1], [0, 0, 1, 1], [], []>} : vector<16x8xf32>, vector<8x384xf32>, vector<16x384xf32> -> vector<16x384xf32>
    %117 = arith.addf %111, %116 : vector<16x384xf32>
    %c0_118 = arith.constant 0 : index
    %c0_119 = arith.constant 0 : index
    %118 = vector.load %arg2[%c0_118, %c0_119] : memref<16x1xf32, #tpu.memory_space<vmem>>, vector<16x1xf32>
    %119 = vector.broadcast %118 : vector<16x1xf32> to vector<16x384xf32>
    %120 = arith.addf %117, %119 : vector<16x384xf32>
    %cst_120 = arith.constant 0.000000e+00 : f32
    %121 = vector.broadcast %cst_120 : f32 to vector<16x384xf32>
    %122 = arith.maximumf %120, %121 : vector<16x384xf32>
    %c1_121 = arith.constant 1 : index
    %c0_122 = arith.constant 0 : index
    %c0_123 = arith.constant 0 : index
    %123 = vector.load %arg4[%c1_121, %c0_122, %c0_123] : memref<2x16x384xf32, #tpu.memory_space<vmem>>, vector<1x16x384xf32>
    %124 = vector.shape_cast %123 : vector<1x16x384xf32> to vector<16x384xf32>
    %125 = vector.shape_cast %122 : vector<16x384xf32> to vector<1x16x384xf32>
    tpu.vector_store %arg4[%c1_121, %c0_122, %c0_123], %125 {strides = array<i32>} : memref<2x16x384xf32, #tpu.memory_space<vmem>>, vector<1x16x384xf32>,
    return
  }
  func.func @transform_0(%arg0: i32) -> (i32, i32, i32) {
    %c0_i32 = arith.constant 0 : i32
    %c0_i32_0 = arith.constant 0 : i32
    %c0_i32_1 = arith.constant 0 : i32
    %c0_i32_2 = arith.constant 0 : i32
    return %c0_i32, %c0_i32_0, %c0_i32_1 : i32, i32, i32
  }
  func.func @transform_1(%arg0: i32) -> (i32, i32) {
    %c0_i32 = arith.constant 0 : i32
    %c0_i32_0 = arith.constant 0 : i32
    %c0_i32_1 = arith.constant 0 : i32
    return %c0_i32, %c0_i32_0 : i32, i32
  }
  func.func @transform_2(%arg0: i32) -> (i32, i32, i32) {
    %c0_i32 = arith.constant 0 : i32
    %c0_i32_0 = arith.constant 0 : i32
    %c0_i32_1 = arith.constant 0 : i32
    %c0_i32_2 = arith.constant 0 : i32
    return %c0_i32, %c0_i32_0, %c0_i32_1 : i32, i32, i32
  }
  func.func @transform_3(%arg0: i32) -> (i32, i32, i32) {
    %c0_i32 = arith.constant 0 : i32
    %c0_i32_0 = arith.constant 0 : i32
    %c0_i32_1 = arith.constant 0 : i32
    %c0_i32_2 = arith.constant 0 : i32
    return %c0_i32, %c0_i32_0, %c0_i32_1 : i32, i32, i32
  }
}

</mosaic_0001>

<bundles_post_ra>
// kernel: inception_forward.1
= control target key start
LH: loop header
LB: loop body
LE: loop exit
PB: predicated region body
PF: predicated region fallthrough
CT: control target
= control target key end

     0   :  { %s2116_s18 = smov 127   ;;  %s2117_s21 = smov 126   ;;  %vm35_vm0 = vcmask 1039360   ;;  %vm204_vm1 = vcmask 1031168   ;;  %vm42_vm2 = vcmask 64512   ;;  %vm303_vm3 = vcmask 850944   ;;  %s2734_s2 = inlined_call_operand.vmem [shape: f32[2,8,512], index: 2, kind: input, shape index: {}]   ;;  %s2735_s0 = inlined_call_operand.vmem [shape: f32[9,16,8], index: 0, kind: input, shape index: {}]   ;;  %s2736_s1 = inlined_call_operand.vmem [shape: f32[16,1], index: 1, kind: input, shape index: {}]   ;;  %s2737_s3 = inlined_call_operand.vmem [shape: f32[2,16,384], index: 3, kind: output, shape index: {}]  }
   0x1   :  { %v2148_v0 = vld [vmem:[%s2734_s2] sm:$0xff]  ;;  %v2153_v1 = vld [vmem:[%s2734_s2 + $0x8] sm:$0xff]  ;;  %v19_v2 = vld [vmem:[%s2734_s2 + $0x18] sm:$0xff]  ;;  %s2118_s22 = smov 104   ;;  %s2119_s23 = smov 103   ;;  %vm402_vm4 = vcmask 842752  }
   0x2   :  { %v1968_v3 = vpack.i.bf16 %v2153_v1, %v2148_v0  ;;  %33 = vrot.lane.b32.xlu1 %v19_v2, %s2116_s18  ;;  %v2164_v4 = vld [vmem:[%s2734_s2 + $0x10] sm:$0xff]  ;;  %s2120_s24 = smov 102   ;;  %s2121_s25 = smov 80   ;;  %v2192_v7 = vld [vmem:[%s2734_s2 + $0x38] sm:$0xff]  ;;  %v2198_v8 = vld [vmem:[%s2734_s2 + $0x20] sm:$0xff]  ;;  %vm501_vm5 = vcmask 834560  }
   0x3   :  { %v1978_v5 = vpack.i.bf16 %v19_v2, %v2164_v4  ;;  %s2122_s26 = smov 79   ;;  %s2123_s27 = smov 78   ;;  %v2187_v6 = vld [vmem:[%s2734_s2 + $0x30] sm:$0xff]  ;;  %v2203_v9 = vld [vmem:[%s2734_s2 + $0x28] sm:$0xff]  ;;  %v2236_v20 = vld [vmem:[%s2735_s0 + $0x18] sm:$0xff]  ;;  %vm600_vm6 = vcmask 654336  }
   0x4   :  { %1969 = vrot.lane.b32.xlu0 %v1968_v3, %s2116_s18  ;;  %v2208_v10 = vpack.i.bf16 %v2192_v7, %v2187_v6  ;;  %v2212_v11 = vpack.i.bf16 %v2203_v9, %v2198_v8  ;;  %v2231_v19 = vld [vmem:[%s2735_s0 + $0x10] sm:$0xff]  ;;  %v2250_v32 = vld [vmem:[%s2735_s0] sm:$0xff]  ;;  %v2273_v45 = vld [vmem:[%s2735_s0 + $0x8] sm:$0xff]  ;;  %vm699_vm7 = vcmask 646144   ;;  %vm798_vm8 = vcmask 637952  }
   0x5   :  { %1979 = vrot.lane.b32.xlu2 %v1978_v5, %s2117_s21  ;;  %v2291_v54 = vld [vmem:[%s2735_s0 + $0x20] sm:$0xff]  ;;  %v2308_v59 = vld [vmem:[%s2735_s0 + $0x30] sm:$0xff]  ;;  %v2314_v61 = vld [vmem:[%s2735_s0 + $0x28] sm:$0xff] }
   0xa   :  { %1974 = vrot.lane.b32.xlu1 %v1968_v3, %s2117_s21 }
   0xc   :  { %31 = vrot.lane.b32.xlu0 %v2164_v4, %s2116_s18 }
   0xd   :  { %1984 = vrot.lane.b32.xlu2 %v1968_v3, %s2118_s22 }
  0x12   :  { %1994 = vrot.lane.b32.xlu1 %v1968_v3, %s2119_s23 }
  0x14   :  { %1989 = vrot.lane.b32.xlu0 %v1978_v5, %s2118_s22 }
  0x15   :  { %1999 = vrot.lane.b32.xlu2 %v1978_v5, %s2119_s23 }
  0x1a   :  { %2009 = vrot.lane.b32.xlu1 %v1978_v5, %s2120_s24 }
  0x1c   :  { %2004 = vrot.lane.b32.xlu0 %v1968_v3, %s2120_s24 }
  0x1d   :  { %2014 = vrot.lane.b32.xlu2 %v1968_v3, %s2121_s25 }
  0x22   :  { %2024 = vrot.lane.b32.xlu1 %v1968_v3, %s2122_s26 }
  0x24   :  { %2019 = vrot.lane.b32.xlu0 %v1978_v5, %s2121_s25 }
  0x25   :  { %2029 = vrot.lane.b32.xlu2 %v1978_v5, %s2122_s26  ;;  %v2332_v5 = vld [vmem:[%s2735_s0 + $0x38] sm:$0xff] }
  0x2a   :  { %794 = vrot.lane.b32.xlu1 %v2164_v4, %s2123_s27 }
  0x2c   :  { %2034 = vrot.lane.b32.xlu0 %v1968_v3, %s2123_s27 }
  0x2d   :  { %796 = vrot.lane.b32.xlu2 %v19_v2, %s2123_s27 }
  0x32   :  { %2044 = vrot.lane.b32.xlu1 %v2208_v10, %s2116_s18 }
  0x34   :  { %2039 = vrot.lane.b32.xlu0 %v2212_v11, %s2116_s18 }
  0x35   :  { %2049 = vrot.lane.b32.xlu2 %v2212_v11, %s2117_s21 }
  0x3a   :  { %2059 = vrot.lane.b32.xlu1 %v2212_v11, %s2118_s22 }
  0x3c   :  { %2054 = vrot.lane.b32.xlu0 %v2208_v10, %s2117_s21 }
  0x3d   :  { %2064 = vrot.lane.b32.xlu2 %v2208_v10, %s2118_s22 }
  0x42   :  { %2074 = vrot.lane.b32.xlu1 %v2208_v10, %s2119_s23 }
  0x44   :  { %2069 = vrot.lane.b32.xlu0 %v2212_v11, %s2119_s23 }
  0x45   :  { %2079 = vrot.lane.b32.xlu2 %v2212_v11, %s2120_s24 }
  0x4a   :  { %2089 = vrot.lane.b32.xlu1 %v2212_v11, %s2121_s25 }
  0x4c   :  { %2084 = vrot.lane.b32.xlu0 %v2208_v10, %s2120_s24 }
  0x4d   :  { %2094 = vrot.lane.b32.xlu2 %v2208_v10, %s2121_s25 }
  0x52   :  { %1584 = vrot.lane.b32.xlu1 %v2187_v6, %s2122_s26 }
  0x54   :  { %2099 = vrot.lane.b32.xlu0 %v2212_v11, %s2122_s26 }
  0x55   :  { %1586 = vrot.lane.b32.xlu2 %v2192_v7, %s2122_s26 }
  0x5a   :  { %2109 = vrot.lane.b32.xlu1 %v2208_v10, %s2123_s27 }
  0x5c   :  { %2104 = vrot.lane.b32.xlu0 %v2212_v11, %s2123_s27 }
  0x5f   :  { %v1980_v12 = vpop.permute.xlu2 %1979 }
  0x60   :  { %v1982_v15 = vunpack.i.h.bf16 %v1980_v12  ;;  %v1981_v16 = vunpack.i.l.bf16 %v1980_v12  ;;  %v2337_v12 = vld [vmem:[%s2735_s0 + $0x40] sm:$0xff] }
  0x62   :  { %v207_v22 = vsel %vm204_vm1, %v1981_v16, %v1982_v15 }
  0x67   :  { %v1985_v23 = vpop.permute.xlu2 %1984 }
  0x68   :  { %v1987_v27 = vunpack.i.h.bf16 %v1985_v23  ;;  %v1986_v28 = vunpack.i.l.bf16 %v1985_v23 }
  0x6a   :  { %v304_v34 = vsel %vm303_vm3, %v1986_v28, %v1987_v27 }
  0x6f   :  { %v2000_v36 = vpop.permute.xlu2 %1999 }
  0x70   :  { %v2001_v38 = vunpack.i.l.bf16 %v2000_v36  ;;  %v2002_v50 = vunpack.i.h.bf16 %v2000_v36 }
  0x72   :  { %v405_v55 = vsel %vm402_vm4, %v2001_v38, %v2002_v50 }
  0x74   :  { %v34_v13 = vpop.permute.xlu1 %33 }
  0x76   :  { %v1970_v14 = vpop.permute.xlu0 %1969 }
  0x77   :  { %v1972_v17 = vunpack.i.h.bf16 %v1970_v14  ;;  %v1971_v18 = vunpack.i.l.bf16 %v1970_v14  ;;  %v2015_v63 = vpop.permute.xlu2 %2014 }
  0x78   :  { %v2016_v2 = vunpack.i.l.bf16 %v2015_v63 }
  0x79   :  { %v36_v21 = vsel %vm35_vm0, %v1971_v18, %v1972_v17 }
  0x7a   :  { %64 = vmatpush.msra.mxu0 %v36_v21  ;;  %1957 = vmatpush.msra.mxu2 %v36_v21  ;;  %v2359_v21 = vld [vmem:[%s2735_s0 + $0x48] sm:$0xff] }
  0x7b   :  { %1809 = vmatmul.msk.f32.vlgmr.msra.gmra.mxu0 %vm42_vm2, %v2231_v19  ;;  %1810 = vmatmul.msk.f32.vlgmr.msra.gmra.mxu2 %vm42_vm2, %v2236_v20 }
  0x7c   :  { %162 = vmatpush.msrb.mxu0 %v2153_v1  ;;  %v1975_v24 = vpop.permute.xlu1 %1974  ;;  %v2017_v1 = vunpack.i.h.bf16 %v2015_v63 }
  0x7d   :  { %v1977_v25 = vunpack.i.h.bf16 %v1975_v24  ;;  %v1976_v26 = vunpack.i.l.bf16 %v1975_v24 }
  0x7e   :  { %278 = vmatpush.msra.mxu0 %v207_v22  ;;  %v32_v29 = vpop.permute.xlu0 %31 }
  0x7f   :  { %v37_v30 = vsel %vm35_vm0, %v1972_v17, %v32_v29  ;;  %v38_v31 = vsel %vm35_vm0, %v32_v29, %v34_v13  ;;  %v205_v33 = vsel %vm204_vm1, %v1976_v26, %v1977_v25  ;;  %v206_v35 = vsel %vm204_vm1, %v1977_v25, %v1981_v16  ;;  %v2030_v10 = vpop.permute.xlu2 %2029  ;;  %v2375_v26 = vld [vmem:[%s2735_s0 + $0x50] sm:$0xff] }
  0x80   :  { %87 = vmatpush.msra.mxu1 %v37_v30  ;;  %1958 = vmatpush.msra.mxu3 %v37_v30  ;;  %v601_v13 = vsel %vm600_vm6, %v2016_v2, %v2017_v1  ;;  %v2031_v23 = vunpack.i.l.bf16 %v2030_v10  ;;  %v2032_v7 = vunpack.i.h.bf16 %v2030_v10 }
  0x81   :  { %110 = vmatpush.msrb.mxu2 %v38_v31  ;;  %1812 = vmatmul.msk.f32.vlgmr.msra.gmra.mxu3 %vm42_vm2, %v2236_v20  ;;  %v2391_v31 = vld [vmem:[%s2735_s0 + $0x58] sm:$0xff] }
  0x82   :  { %139 = vmatpush.msrb.mxu3 %v2148_v0  ;;  %1811 = vmatmul.msk.f32.vlgmr.msra.gmra.mxu1 %vm42_vm2, %v2231_v19  ;;  %v702_v30 = vsel %vm699_vm7, %v2031_v23, %v2032_v7 }
  0x83   :  { %1813 = vmatmul.msk.f32.vlgmr.msrb.gmra.mxu2 %vm42_vm2, %v2231_v19  ;;  %1817 = vmatmul.msk.f32.vlgmr.msrb.gmra.mxu0 %vm42_vm2, %v2250_v32 }
  0x84   :  { %185 = vmatpush.msrb.mxu1 %v2164_v4  ;;  %232 = vmatpush.msra.mxu2 %v205_v33  ;;  %v1995_v37 = vpop.permute.xlu1 %1994 }
  0x85   :  { %255 = vmatpush.msra.mxu3 %v206_v35  ;;  %v1997_v39 = vunpack.i.h.bf16 %v1995_v37  ;;  %v1996_v40 = vunpack.i.l.bf16 %v1995_v37 }
  0x86   :  { %331 = vmatpush.msra.mxu1 %v304_v34  ;;  %v1990_v41 = vpop.permute.xlu0 %1989 }
  0x87   :  { %v1992_v42 = vunpack.i.h.bf16 %v1990_v41  ;;  %v1991_v43 = vunpack.i.l.bf16 %v1990_v41  ;;  %v403_v44 = vsel %vm402_vm4, %v1996_v40, %v1997_v39  ;;  %v404_v48 = vsel %vm402_vm4, %v1997_v39, %v2001_v38  ;;  %v797_v38 = vpop.permute.xlu2 %796  ;;  %v2405_v39 = vld [vmem:[%s2735_s0 + $0x60] sm:$0xff] }
  0x88   :  { %430 = vmatpush.msrb.mxu0 %v403_v44 }
  0x89   :  { %1815 = vmatmul.msk.f32.vlgmr.msrb.gmra.mxu3 %vm42_vm2, %v2250_v32  ;;  %v305_v46 = vsel %vm303_vm3, %v1987_v27, %v1991_v43  ;;  %v306_v47 = vsel %vm303_vm3, %v1991_v43, %v1992_v42  ;;  %v887_v43 = vld [vmem:[%s2736_s1 + $0x8] sm:$0xff] }
  0x8a   :  { %1819 = vmatmul.msk.f32.vlgmr.msrb.gmra.mxu1 %vm42_vm2, %v2250_v32  ;;  %354 = vmatpush.msrb.mxu2 %v305_v46  ;;  %v2124_v46 = vmov 0  }
  0x8b   :  { %1814 = vmatmul.msk.f32.gmra.mxu2 %vm42_vm2, %v2236_v20  ;;  %1818 = vmatmul.msk.f32.gmra.mxu0 %vm42_vm2, %v2273_v45 }
  0x8c   :  { %377 = vmatpush.msrb.mxu3 %v306_v47  ;;  %453 = vmatpush.msrb.mxu1 %v404_v48  ;;  %v2010_v49 = vpop.permute.xlu1 %2009  ;;  %v2423_v47 = vld [vmem:[%s2735_s0 + $0x70] sm:$0xff] }
  0x8d   :  { %v2011_v51 = vunpack.i.l.bf16 %v2010_v49  ;;  %v2012_v58 = vunpack.i.h.bf16 %v2010_v49  ;;  %2114 = vset.pattern.permute.xlu0 %v2124_v46  ;;  %2113 = vset.pattern.permute.xlu2 %v2124_v46  ;;  %v2429_v49 = vld [vmem:[%s2735_s0 + $0x68] sm:$0xff] }
  0x8e   :  { %v2005_v52 = vpop.permute.xlu0 %2004  ;;  %895 = vperm.xlu0 %2114, %v887_v43   ;;  %2115 = vset.pattern.permute.xlu1 %v2124_v46 }
  0x8f   :  { %v2007_v53 = vunpack.i.h.bf16 %v2005_v52  ;;  %v2006_v57 = vunpack.i.l.bf16 %v2005_v52  ;;  %v504_v62 = vsel %vm501_vm5, %v2011_v51, %v2012_v58  ;;  %v2448_v52 = vld [vmem:[%s2735_s0 + $0x80] sm:$0xff]  ;;  %v2466_v58 = vld [vmem:[%s2735_s0 + $0x88] sm:$0xff] }
  0x91   :  { %1816 = vmatmul.msk.f32.gmra.mxu3 %vm42_vm2, %v2273_v45  ;;  %v503_v56 = vsel %vm501_vm5, %v2007_v53, %v2011_v51  ;;  %v502_v60 = vsel %vm501_vm5, %v2006_v57, %v2007_v53  ;;  %v2443_v51 = vld [vmem:[%s2735_s0 + $0x78] sm:$0xff]  ;;  %v2050_v53 = vpop.permute.xlu2 %2049 }
  0x92   :  { %1820 = vmatmul.msk.f32.gmra.mxu1 %vm42_vm2, %v2273_v45  ;;  %v2051_v57 = vunpack.i.l.bf16 %v2050_v53 }
  0x93   :  { %1823 = vmatmul.msk.f32.vlgmr.msra.gmra.mxu2 %vm42_vm2, %v2291_v54  ;;  %1827 = vmatmul.msk.f32.vlgmr.msra.gmra.mxu0 %vm42_vm2, %v2291_v54 }
  0x94   :  { %476 = vmatpush.msra.mxu2 %v405_v55  ;;  %552 = vmatpush.msra.mxu0 %v503_v56  ;;  %v2025_v15 = vpop.permute.xlu1 %2024  ;;  %v886_v55 = vld [vmem:[%s2736_s1] sm:$0xff]  ;;  %v2052_v56 = vunpack.i.h.bf16 %v2050_v53 }
  0x95   :  { %v2027_v16 = vunpack.i.h.bf16 %v2025_v15  ;;  %v2026_v17 = vunpack.i.l.bf16 %v2025_v15  ;;  %890 = vperm.xlu2 %2113, %v886_v55   ;;  %1776 = vperm.xlu1 %2115, %v886_v55  }
  0x96   :  { %v2020_v0 = vpop.permute.xlu0 %2019 }
  0x97   :  { %v2022_v3 = vunpack.i.h.bf16 %v2020_v0  ;;  %v2021_v4 = vunpack.i.l.bf16 %v2020_v0  ;;  %v700_v22 = vsel %vm699_vm7, %v2026_v17, %v2027_v16  ;;  %v701_v28 = vsel %vm699_vm7, %v2027_v16, %v2031_v23 }
  0x99   :  { %1825 = vmatmul.msk.f32.vlgmr.msra.gmra.mxu3 %vm42_vm2, %v2291_v54  ;;  %v603_v14 = vsel %vm600_vm6, %v2021_v4, %v2022_v3  ;;  %v602_v18 = vsel %vm600_vm6, %v2017_v1, %v2021_v4  ;;  %v2065_v2 = vpop.permute.xlu2 %2064 }
  0x9a   :  { %1831 = vmatmul.msk.f32.vlgmr.msra.gmra.mxu1 %vm42_vm2, %v2308_v59  ;;  %529 = vmatpush.msra.mxu3 %v502_v60  ;;  %v1103_v60 = vsel %vm204_vm1, %v2051_v57, %v2052_v56  ;;  %v2066_v4 = vunpack.i.l.bf16 %v2065_v2  ;;  %v2067_v17 = vunpack.i.h.bf16 %v2065_v2 }
  0x9b   :  { %1824 = vmatmul.msk.f32.gmra.mxu2 %vm42_vm2, %v2314_v61  ;;  %1828 = vmatmul.msk.f32.gmra.mxu0 %vm42_vm2, %v2314_v61 }
  0x9c   :  { %575 = vmatpush.msra.mxu1 %v504_v62  ;;  %v795_v27 = vpop.permute.xlu1 %794  ;;  %v1202_v10 = vsel %vm303_vm3, %v2066_v4, %v2067_v17 }
  0x9d   :  { %v801_v40 = vsel %vm798_vm8, %v795_v27, %v797_v38  ;;  %1781 = vperm.xlu2 %2113, %v887_v43  }
  0x9e   :  { %v2035_v11 = vpop.permute.xlu0 %2034 }
  0x9f   :  { %v2037_v24 = vunpack.i.h.bf16 %v2035_v11  ;;  %v2036_v25 = vunpack.i.l.bf16 %v2035_v11 }
  0xa1   :  { %1826 = vmatmul.msk.f32.gmra.mxu3 %vm42_vm2, %v2314_v61  ;;  %v799_v29 = vsel %vm798_vm8, %v2036_v25, %v2037_v24  ;;  %v800_v33 = vsel %vm798_vm8, %v2037_v24, %v795_v27 }
  0xa2   :  { %1832 = vmatmul.msk.f32.gmra.mxu1 %vm42_vm2, %v2332_v5 }
  0xa3   :  { %1833 = vmatmul.msk.f32.vlgmr.msrb.gmra.mxu2 %vm42_vm2, %v2308_v59  ;;  %1839 = vmatmul.msk.f32.vlgmr.msrb.gmra.mxu0 %vm42_vm2, %v2337_v12 }
  0xa4   :  { %628 = vmatpush.msrb.mxu2 %v601_v13  ;;  %674 = vmatpush.msrb.mxu0 %v603_v14  ;;  %v2045_v34 = vpop.permute.xlu1 %2044 }
  0xa5   :  { %v2046_v36 = vunpack.i.l.bf16 %v2045_v34  ;;  %v2047_v44 = vunpack.i.h.bf16 %v2045_v34 }
  0xa6   :  { %v2040_v35 = vpop.permute.xlu0 %2039 }
  0xa7   :  { %v2042_v37 = vunpack.i.h.bf16 %v2040_v35  ;;  %v2041_v42 = vunpack.i.l.bf16 %v2040_v35  ;;  %v939_v50 = vsel %vm35_vm0, %v2046_v36, %v2047_v44 }
  0xa9   :  { %1835 = vmatmul.msk.f32.vlgmr.msrb.gmra.mxu3 %vm42_vm2, %v2308_v59  ;;  %v938_v41 = vsel %vm35_vm0, %v2042_v37, %v2046_v36  ;;  %v937_v48 = vsel %vm35_vm0, %v2041_v42, %v2042_v37 }
  0xaa   :  { %1841 = vmatmul.msk.f32.vlgmr.msrb.gmra.mxu1 %vm42_vm2, %v2337_v12  ;;  %651 = vmatpush.msrb.mxu3 %v602_v18 }
  0xab   :  { %1834 = vmatmul.msk.f32.gmra.mxu2 %vm42_vm2, %v2332_v5  ;;  %1840 = vmatmul.msk.f32.gmra.mxu0 %vm42_vm2, %v2359_v21 }
  0xac   :  { %727 = vmatpush.msrb.mxu1 %v700_v22  ;;  %v2060_v62 = vpop.permute.xlu1 %2059 }
  0xad   :  { %v2062_v63 = vunpack.i.h.bf16 %v2060_v62  ;;  %v2061_v0 = vunpack.i.l.bf16 %v2060_v62 }
  0xaf   :  { %v1201_v14 = vsel %vm303_vm3, %v2062_v63, %v2066_v4 }
  0xb1   :  { %1836 = vmatmul.msk.f32.gmra.mxu3 %vm42_vm2, %v2332_v5 }
  0xb2   :  { %1842 = vmatmul.msk.f32.gmra.mxu1 %vm42_vm2, %v2359_v21 }
  0xb3   :  { %1843 = vmatmul.msk.f32.vlgmr.msra.gmra.mxu2 %vm42_vm2, %v2337_v12  ;;  %1849 = vmatmul.msk.f32.vlgmr.msra.gmra.mxu0 %vm42_vm2, %v2375_v26 }
  0xb4   :  { %750 = vmatpush.msra.mxu2 %v701_v28  ;;  %826 = vmatpush.msra.mxu0 %v799_v29  ;;  %v2075_v15 = vpop.permute.xlu1 %2074 }
  0xb5   :  { %v2076_v18 = vunpack.i.l.bf16 %v2075_v15  ;;  %v2077_v23 = vunpack.i.h.bf16 %v2075_v15 }
  0xb7   :  { %v1299_v27 = vsel %vm402_vm4, %v2076_v18, %v2077_v23 }
  0xb9   :  { %1847 = vmatmul.msk.f32.vlgmr.msra.gmra.mxu3 %vm42_vm2, %v2375_v26 }
  0xba   :  { %1851 = vmatmul.msk.f32.vlgmr.msra.gmra.mxu1 %vm42_vm2, %v2375_v26  ;;  %773 = vmatpush.msra.mxu3 %v702_v30 }
  0xbb   :  { %1844 = vmatmul.msk.f32.gmra.mxu2 %vm42_vm2, %v2359_v21  ;;  %1850 = vmatmul.msk.f32.gmra.mxu0 %vm42_vm2, %v2391_v31 }
  0xbc   :  { %849 = vmatpush.msra.mxu1 %v800_v33  ;;  %v2090_v38 = vpop.permute.xlu1 %2089 }
  0xc1   :  { %1848 = vmatmul.msk.f32.gmra.mxu3 %vm42_vm2, %v2391_v31 }
  0xc2   :  { %1852 = vmatmul.msk.f32.gmra.mxu1 %vm42_vm2, %v2391_v31 }
  0xc3   :  { %1855 = vmatmul.msk.f32.vlgmr.msrb.gmra.mxu2 %vm42_vm2, %v2405_v39  ;;  %1859 = vmatmul.msk.f32.vlgmr.msrb.gmra.mxu0 %vm42_vm2, %v2405_v39 }
  0xc4   :  { %872 = vmatpush.msrb.mxu2 %v801_v40  ;;  %987 = vmatpush.msrb.mxu0 %v938_v41  ;;  %v2092_v41 = vunpack.i.h.bf16 %v2090_v38 }
  0xc9   :  { %1857 = vmatmul.msk.f32.vlgmr.msrb.gmra.mxu3 %vm42_vm2, %v2405_v39 }
  0xca   :  { %1863 = vmatmul.msk.f32.vlgmr.msrb.gmra.mxu1 %vm42_vm2, %v2423_v47  ;;  %964 = vmatpush.msrb.mxu3 %v937_v48 }
  0xcb   :  { %1856 = vmatmul.msk.f32.gmra.mxu2 %vm42_vm2, %v2429_v49  ;;  %1860 = vmatmul.msk.f32.gmra.mxu0 %vm42_vm2, %v2429_v49 }
  0xcc   :  { %1010 = vmatpush.msrb.mxu1 %v939_v50 }
  0xd1   :  { %1858 = vmatmul.msk.f32.gmra.mxu3 %vm42_vm2, %v2429_v49 }
  0xd2   :  { %1864 = vmatmul.msk.f32.gmra.mxu1 %vm42_vm2, %v2443_v51 }
  0xd3   :  { %1865 = vmatmul.msk.f32.vlgmr.msra.gmra.mxu2 %vm42_vm2, %v2423_v47  ;;  %1871 = vmatmul.msk.f32.vlgmr.msra.gmra.mxu0 %vm42_vm2, %v2448_v52 }
  0xd4   :  { %1039 = vmatpush.msra.mxu2 %v2198_v8  ;;  %1085 = vmatpush.msra.mxu0 %v2187_v6  ;;  %v2055_v6 = vpop.permute.xlu0 %2054 }
  0xd5   :  { %v2056_v8 = vunpack.i.l.bf16 %v2055_v6  ;;  %v2057_v3 = vunpack.i.h.bf16 %v2055_v6 }
  0xd7   :  { %v1104_v1 = vsel %vm204_vm1, %v2052_v56, %v2056_v8  ;;  %v1105_v13 = vsel %vm204_vm1, %v2056_v8, %v2057_v3 }
  0xd9   :  { %1867 = vmatmul.msk.f32.vlgmr.msra.gmra.mxu3 %vm42_vm2, %v2423_v47 }
  0xda   :  { %1873 = vmatmul.msk.f32.vlgmr.msra.gmra.mxu1 %vm42_vm2, %v2448_v52  ;;  %1062 = vmatpush.msra.mxu3 %v2203_v9  ;;  %v1200_v9 = vsel %vm303_vm3, %v2061_v0, %v2062_v63  ;;  %v1585_v63 = vpop.permute.xlu1 %1584 }
  0xdb   :  { %1866 = vmatmul.msk.f32.gmra.mxu2 %vm42_vm2, %v2443_v51  ;;  %1872 = vmatmul.msk.f32.gmra.mxu0 %vm42_vm2, %v2466_v58 }
  0xdc   :  { %1130 = vmatpush.msra.mxu1 %v1103_v60  ;;  %v2070_v16 = vpop.permute.xlu0 %2069 }
  0xdd   :  { %v2072_v22 = vunpack.i.h.bf16 %v2070_v16  ;;  %v2071_v11 = vunpack.i.l.bf16 %v2070_v16 }
  0xdf   :  { %v1297_v24 = vsel %vm402_vm4, %v2071_v11, %v2072_v22 }
  0xe1   :  { %1868 = vmatmul.msk.f32.gmra.mxu3 %vm42_vm2, %v2443_v51 }
  0xe2   :  { %1874 = vmatmul.msk.f32.gmra.mxu1 %vm42_vm2, %v2466_v58  ;;  %v2110_v17 = vpop.permute.xlu1 %2109 }
  0xe3   :  { %1875 = vmatmul.msk.f32.vlgmr.msrb.gmra.mxu2 %vm42_vm2, %v2448_v52  ;;  %1885 = vmatmul.msk.f32.vlgmr.msrb.gmra.mxu0 %vm42_vm2, %v2231_v19 }
  0xe4   :  { %1153 = vmatpush.msrb.mxu2 %v1104_v1  ;;  %1227 = vmatpush.msrb.mxu0 %v1200_v9  ;;  %v2085_v28 = vpop.permute.xlu0 %2084 }
  0xe5   :  { %v2087_v30 = vunpack.i.h.bf16 %v2085_v28  ;;  %v2086_v33 = vunpack.i.l.bf16 %v2085_v28 }
  0xe7   :  { %v1396_v37 = vsel %vm501_vm5, %v2086_v33, %v2087_v30 }
  0xe9   :  { %1883 = vmatmul.msk.f32.vlgmr.msrb.gmra.mxu3 %vm42_vm2, %v2231_v19 }
  0xea   :  { %1887 = vmatmul.msk.f32.vlgmr.msrb.gmra.mxu1 %vm42_vm2, %v2231_v19  ;;  %1176 = vmatpush.msrb.mxu3 %v1105_v13  ;;  %v1298_v19 = vsel %vm402_vm4, %v2072_v22, %v2076_v18 }
  0xeb   :  { %1876 = vmatmul.msk.f32.gmra.mxu2 %vm42_vm2, %v2466_v58  ;;  %1886 = vmatmul.msk.f32.gmra.mxu0 %vm42_vm2, %v2236_v20 }
  0xec   :  { %1250 = vmatpush.msrb.mxu1 %v1201_v14  ;;  %v2100_v60 = vpop.permute.xlu0 %2099 }
  0xed   :  { %v2102_v8 = vunpack.i.h.bf16 %v2100_v60  ;;  %v2101_v62 = vunpack.i.l.bf16 %v2100_v60 }
  0xef   :  { %v1588_v9 = vsel %vm699_vm7, %v2101_v62, %v2102_v8 }
  0xf1   :  { %1884 = vmatmul.msk.f32.gmra.mxu3 %vm42_vm2, %v2236_v20 }
  0xf2   :  { %1888 = vmatmul.msk.f32.gmra.mxu1 %vm42_vm2, %v2236_v20  ;;  %v2080_v20 = vpop.permute.xlu2 %2079 }
  0xf3   :  { %1889 = vmatmul.msk.f32.vlgmr.msra.gmra.mxu2 %vm42_vm2, %v2250_v32  ;;  %1893 = vmatmul.msk.f32.vlgmr.msra.gmra.mxu0 %vm42_vm2, %v2250_v32  ;;  %v2082_v29 = vunpack.i.h.bf16 %v2080_v20  ;;  %v2081_v7 = vunpack.i.l.bf16 %v2080_v20 }
  0xf4   :  { %1273 = vmatpush.msra.mxu2 %v1202_v10  ;;  %1347 = vmatpush.msra.mxu0 %v1298_v19  ;;  %v2105_v18 = vpop.permute.xlu0 %2104  ;;  %v2111_v10 = vunpack.i.l.bf16 %v2110_v17 }
  0xf5   :  { %v1394_v36 = vsel %vm501_vm5, %v2081_v7, %v2082_v29  ;;  %v1395_v44 = vsel %vm501_vm5, %v2082_v29, %v2086_v33  ;;  %v2107_v19 = vunpack.i.h.bf16 %v2105_v18  ;;  %v2106_v20 = vunpack.i.l.bf16 %v2105_v18 }
  0xf6   :  { %v2112_v29 = vunpack.i.h.bf16 %v2110_v17 }
  0xf7   :  { %v1685_v33 = vsel %vm798_vm8, %v2106_v20, %v2107_v19 }
  0xf8   :  { %v2509_v25 = vpop.f32.mrf.mxu0 }
  0xf9   :  { %1891 = vmatmul.msk.f32.vlgmr.msra.gmra.mxu3 %vm42_vm2, %v2250_v32 }
  0xfa   :  { %1897 = vmatmul.msk.f32.vlgmr.msra.gmra.mxu1 %vm42_vm2, %v2291_v54  ;;  %1324 = vmatpush.msra.mxu3 %v1297_v24  ;;  %v2095_v50 = vpop.permute.xlu2 %2094 }
  0xfb   :  { %1890 = vmatmul.msk.f32.gmra.mxu2 %vm42_vm2, %v2273_v45  ;;  %1894 = vmatmul.msk.f32.gmra.mxu0 %vm42_vm2, %v2273_v45  ;;  %v2096_v55 = vunpack.i.l.bf16 %v2095_v50  ;;  %v2097_v2 = vunpack.i.h.bf16 %v2095_v50 }
  0xfc   :  { %1370 = vmatpush.msra.mxu1 %v1299_v27 }
  0xfd   :  { %v1492_v1 = vsel %vm600_vm6, %v2092_v41, %v2096_v55  ;;  %v1493_v14 = vsel %vm600_vm6, %v2096_v55, %v2097_v2 }
  0xfe   :  { %v2520_v32 = vpop.f32.mrf.mxu2 }
  0xff   :  { %v2522_v34 = vpop.f32.mrf.mxu1 }
 0x100   :  { %v2524_v35 = vpop.f32.mrf.mxu0 }
 0x101   :  { %1892 = vmatmul.msk.f32.gmra.mxu3 %vm42_vm2, %v2273_v45  ;;  %v2091_v45 = vunpack.i.l.bf16 %v2090_v38 }
 0x102   :  { %1898 = vmatmul.msk.f32.gmra.mxu1 %vm42_vm2, %v2314_v61  ;;  %v1587_v23 = vpop.permute.xlu2 %1586 }
 0x103   :  { %1899 = vmatmul.msk.f32.vlgmr.msrb.gmra.mxu2 %vm42_vm2, %v2291_v54  ;;  %1905 = vmatmul.msk.f32.vlgmr.msrb.gmra.mxu0 %vm42_vm2, %v2308_v59  ;;  %v1491_v48 = vsel %vm600_vm6, %v2091_v45, %v2092_v41 }
 0x104   :  { %v2536_v40 = vpop.f32.mrf.mxu3  ;;  %1421 = vmatpush.msrb.mxu2 %v1394_v36  ;;  %1467 = vmatpush.msrb.mxu0 %v1396_v37 }
 0x106   :  { %v112_v42 = vpop.f32.mrf.mxu2 }
 0x107   :  { %v187_v43 = vpop.f32.mrf.mxu1 }
 0x108   :  { %v2539_v46 = vpop.f32.mrf.mxu0  ;;  %v188_v57 = vadd.f32 %v187_v43, %v112_v42 }
 0x109   :  { %1901 = vmatmul.msk.f32.vlgmr.msrb.gmra.mxu3 %vm42_vm2, %v2291_v54 }
 0x10a   :  { %1907 = vmatmul.msk.f32.vlgmr.msrb.gmra.mxu1 %vm42_vm2, %v2308_v59  ;;  %1444 = vmatpush.msrb.mxu3 %v1395_v44 }
 0x10b   :  { %1900 = vmatmul.msk.f32.gmra.mxu2 %vm42_vm2, %v2314_v61  ;;  %1906 = vmatmul.msk.f32.gmra.mxu0 %vm42_vm2, %v2332_v5 }
 0x10c   :  { %v2550_v53 = vpop.f32.mrf.mxu3  ;;  %1518 = vmatpush.msrb.mxu1 %v1491_v48 }
 0x10d   :  { %v142_v50 = vadd.f32 %v2550_v53, %v2509_v25 }
 0x10e   :  { %v115_v56 = vpop.f32.mrf.mxu2 }
 0x10f   :  { %v190_v54 = vpop.f32.mrf.mxu1 }
 0x110   :  { %v280_v6 = vpop.f32.mrf.mxu0 }
 0x111   :  { %v2552_v0 = vadd.f32 %v280_v6, %v188_v57  ;;  %1902 = vmatmul.msk.f32.gmra.mxu3 %vm42_vm2, %v2314_v61  ;;  %v191_v61 = vadd.f32 %v190_v54, %v115_v56 }
 0x112   :  { %1908 = vmatmul.msk.f32.gmra.mxu1 %vm42_vm2, %v2332_v5 }
 0x113   :  { %1909 = vmatmul.msk.f32.vlgmr.msra.gmra.mxu2 %vm42_vm2, %v2308_v59  ;;  %1915 = vmatmul.msk.f32.vlgmr.msra.gmra.mxu0 %vm42_vm2, %v2337_v12  ;;  %v1589_v59 = vsel %vm699_vm7, %v2102_v8, %v1585_v63 }
 0x114   :  { %v2564_v3 = vpop.f32.mrf.mxu3  ;;  %1541 = vmatpush.msra.mxu2 %v1492_v1  ;;  %1615 = vmatpush.msra.mxu0 %v1588_v9 }
 0x115   :  { %v145_v54 = vadd.f32 %v2564_v3, %v2520_v32 }
 0x116   :  { %v2566_v4 = vpop.f32.mrf.mxu2 }
 0x117   :  { %v2568_v13 = vpop.f32.mrf.mxu1 }
 0x118   :  { %v283_v15 = vpop.f32.mrf.mxu0 }
 0x119   :  { %v2571_v16 = vadd.f32 %v283_v15, %v191_v61  ;;  %1913 = vmatmul.msk.f32.vlgmr.msra.gmra.mxu3 %vm42_vm2, %v2337_v12 }
 0x11a   :  { %1917 = vmatmul.msk.f32.vlgmr.msra.gmra.mxu1 %vm42_vm2, %v2337_v12  ;;  %1564 = vmatpush.msra.mxu3 %v1493_v14  ;;  %v1590_v12 = vsel %vm699_vm7, %v1585_v63, %v1587_v23 }
 0x11b   :  { %1910 = vmatmul.msk.f32.gmra.mxu2 %vm42_vm2, %v2332_v5  ;;  %1916 = vmatmul.msk.f32.gmra.mxu0 %vm42_vm2, %v2359_v21  ;;  %v1686_v5 = vsel %vm798_vm8, %v2107_v19, %v2111_v10 }
 0x11c   :  { %v2582_v22 = vpop.f32.mrf.mxu3  ;;  %1638 = vmatpush.msra.mxu1 %v1589_v59 }
 0x11e   :  { %v237_v11 = vpop.f32.mrf.mxu2 }
 0x11f   :  { %v2584_v24 = vpop.f32.mrf.mxu1  ;;  %v289_v62 = vadd.f32 %v237_v11, %v145_v54 }
 0x120   :  { %v432_v27 = vpop.f32.mrf.mxu0 }
 0x121   :  { %1914 = vmatmul.msk.f32.gmra.mxu3 %vm42_vm2, %v2359_v21 }
 0x122   :  { %1918 = vmatmul.msk.f32.gmra.mxu1 %vm42_vm2, %v2359_v21  ;;  %v1687_v21 = vsel %vm798_vm8, %v2111_v10, %v2112_v29 }
 0x123   :  { %1921 = vmatmul.msk.f32.vlgmr.msrb.gmra.mxu2 %vm42_vm2, %v2375_v26  ;;  %1925 = vmatmul.msk.f32.vlgmr.msrb.gmra.mxu0 %vm42_vm2, %v2375_v26 }
 0x124   :  { %v2596_v28 = vpop.f32.mrf.mxu3  ;;  %1661 = vmatpush.msrb.mxu2 %v1590_v12  ;;  %1735 = vmatpush.msrb.mxu0 %v1686_v5  ;;  %v896_v5 = vpop.permute.xlu0 %895 }
 0x126   :  { %v356_v7 = vpop.f32.mrf.mxu2 }
 0x127   :  { %v455_v30 = vpop.f32.mrf.mxu1 }
 0x128   :  { %v435_v36 = vpop.f32.mrf.mxu0 }
 0x129   :  { %1923 = vmatmul.msk.f32.vlgmr.msrb.gmra.mxu3 %vm42_vm2, %v2375_v26 }
 0x12a   :  { %1929 = vmatmul.msk.f32.vlgmr.msrb.gmra.mxu1 %vm42_vm2, %v2405_v39  ;;  %1712 = vmatpush.msrb.mxu3 %v1685_v33 }
 0x12b   :  { %1922 = vmatmul.msk.f32.gmra.mxu2 %vm42_vm2, %v2391_v31  ;;  %1926 = vmatmul.msk.f32.gmra.mxu0 %vm42_vm2, %v2391_v31 }
 0x12c   :  { %v2608_v37 = vpop.f32.mrf.mxu3  ;;  %1758 = vmatpush.msrb.mxu1 %v1687_v21 }
 0x12d   :  { %v387_v29 = vadd.f32 %v2608_v37, %v2552_v0 }
 0x12e   :  { %v359_v38 = vpop.f32.mrf.mxu2 }
 0x12f   :  { %v2610_v41 = vpop.f32.mrf.mxu1 }
 0x130   :  { %v554_v45 = vpop.f32.mrf.mxu0 }
 0x131   :  { %1924 = vmatmul.msk.f32.gmra.mxu3 %vm42_vm2, %v2391_v31 }
 0x132   :  { %1930 = vmatmul.msk.f32.gmra.mxu1 %vm42_vm2, %v2429_v49 }
 0x133   :  { %1931 = vmatmul.msk.f32.vlgmr.msra.gmra.mxu2 %vm42_vm2, %v2405_v39  ;;  %1937 = vmatmul.msk.f32.vlgmr.msra.gmra.mxu0 %vm42_vm2, %v2423_v47 }
 0x134   :  { %v2620_v26 = vpop.f32.mrf.mxu3 }
 0x136   :  { %v2622_v42 = vpop.f32.mrf.mxu2 }
 0x137   :  { %v2624_v43 = vpop.f32.mrf.mxu1  ;;  %v486_v21 = vadd.f32 %v2622_v42, %v387_v29  ;;  %v390_v42 = vadd.f32 %v2620_v26, %v2571_v16 }
 0x138   :  { %v2626_v44 = vpop.f32.mrf.mxu0 }
 0x139   :  { %1933 = vmatmul.msk.f32.vlgmr.msra.gmra.mxu3 %vm42_vm2, %v2405_v39  ;;  %v286_v39 = vadd.f32 %v2566_v4, %v142_v50  ;;  %v585_v37 = vadd.f32 %v2624_v43, %v486_v21 }
 0x13a   :  { %1939 = vmatmul.msk.f32.vlgmr.msra.gmra.mxu1 %vm42_vm2, %v2423_v47 }
 0x13b   :  { %1932 = vmatmul.msk.f32.gmra.mxu2 %vm42_vm2, %v2429_v49  ;;  %1938 = vmatmul.msk.f32.gmra.mxu0 %vm42_vm2, %v2443_v51  ;;  %v385_v25 = vadd.f32 %v2568_v13, %v286_v39  ;;  %v891_v13 = vpop.permute.xlu2 %890 }
 0x13c   :  { %v531_v31 = vpop.f32.mrf.mxu3 }
 0x13d   :  { %v484_v60 = vadd.f32 %v432_v27, %v385_v25 }
 0x13e   :  { %v2636_v48 = vpop.f32.mrf.mxu2 }
 0x13f   :  { %v2640_v55 = vpop.f32.mrf.mxu1  ;;  %v583_v63 = vadd.f32 %v531_v31, %v484_v60  ;;  %v489_v54 = vadd.f32 %v2636_v48, %v390_v42 }
 0x140   :  { %v2642_v56 = vpop.f32.mrf.mxu0 }
 0x141   :  { %1934 = vmatmul.msk.f32.gmra.mxu3 %vm42_vm2, %v2429_v49  ;;  %v165_v49 = vadd.f32 %v2524_v35, %v2522_v34  ;;  %v388_v34 = vadd.f32 %v2584_v24, %v289_v62 }
 0x142   :  { %1940 = vmatmul.msk.f32.gmra.mxu1 %vm42_vm2, %v2443_v51 }
 0x143   :  { %1941 = vmatmul.msk.f32.vlgmr.msrb.gmra.mxu2 %vm42_vm2, %v2423_v47  ;;  %1947 = vmatmul.msk.f32.vlgmr.msrb.gmra.mxu0 %vm42_vm2, %v2448_v52  ;;  %v287_v47 = vadd.f32 %v2582_v22, %v165_v49  ;;  %v487_v2 = vadd.f32 %v435_v36, %v388_v34 }
 0x144   :  { %v534_v57 = vpop.f32.mrf.mxu3 }
 0x145   :  { %v386_v35 = vadd.f32 %v356_v7, %v287_v47  ;;  %v586_v15 = vadd.f32 %v534_v57, %v487_v2  ;;  %v684_v57 = vadd.f32 %v2642_v56, %v585_v37  ;;  %v588_v47 = vadd.f32 %v2640_v55, %v489_v54 }
 0x146   :  { %v630_v53 = vpop.f32.mrf.mxu2 }
 0x147   :  { %v729_v6 = vpop.f32.mrf.mxu1  ;;  %v682_v1 = vadd.f32 %v630_v53, %v583_v63  ;;  %v485_v14 = vadd.f32 %v455_v30, %v386_v35 }
 0x148   :  { %v2656_v8 = vpop.f32.mrf.mxu0 }
 0x149   :  { %1945 = vmatmul.msk.f32.vlgmr.msrb.gmra.mxu3 %vm42_vm2, %v2448_v52  ;;  %v781_v3 = vadd.f32 %v729_v6, %v682_v1  ;;  %v584_v17 = vadd.f32 %v554_v45, %v485_v14  ;;  %v687_v16 = vadd.f32 %v2656_v8, %v588_v47 }
 0x14a   :  { %1949 = vmatmul.msk.f32.vlgmr.msrb.gmra.mxu1 %vm42_vm2, %v2448_v52  ;;  %v168_v52 = vadd.f32 %v2539_v46, %v2536_v40 }
 0x14b   :  { %1942 = vmatmul.msk.f32.gmra.mxu2 %vm42_vm2, %v2443_v51  ;;  %1948 = vmatmul.msk.f32.gmra.mxu0 %vm42_vm2, %v2466_v58 }
 0x14c   :  { %v653_v32 = vpop.f32.mrf.mxu3  ;;  %v290_v51 = vadd.f32 %v2596_v28, %v168_v52 }
 0x14d   :  { %v683_v11 = vadd.f32 %v653_v32, %v584_v17 }
 0x14e   :  { %v633_v9 = vpop.f32.mrf.mxu2  ;;  %v389_v19 = vadd.f32 %v359_v38, %v290_v51 }
 0x14f   :  { %v732_v4 = vpop.f32.mrf.mxu1  ;;  %v685_v18 = vadd.f32 %v633_v9, %v586_v15 }
 0x150   :  { %v828_v61 = vpop.f32.mrf.mxu0 }
 0x151   :  { %v880_v59 = vadd.f32 %v828_v61, %v781_v3  ;;  %1946 = vmatmul.msk.f32.gmra.mxu3 %vm42_vm2, %v2466_v58  ;;  %v784_v40 = vadd.f32 %v732_v4, %v685_v18 }
 0x152   :  { %1950 = vmatmul.msk.f32.gmra.mxu1 %vm42_vm2, %v2466_v58  ;;  %v488_v58 = vadd.f32 %v2610_v41, %v389_v19 }
 0x153   :  { %v898_v22 = vadd.f32 %v891_v13, %v880_v59 }
 0x154   :  { %v656_v10 = vpop.f32.mrf.mxu3  ;;  %v587_v7 = vadd.f32 %v2626_v44, %v488_v58 }
 0x155   :  { %v904_v23 = vmax.f32 %v898_v22, 0.0 }
 0x156   :  { %v752_v24 = vpop.f32.mrf.mxu2  ;;  %v686_v38 = vadd.f32 %v656_v10, %v587_v7 }
 0x157   :  { %910 = vst [vmem:[%s2737_s3] sm:$0xff] %v904_v23  ;;  %v782_v46 = vadd.f32 %v752_v24, %v683_v11  ;;  %v851_v27 = vpop.f32.mrf.mxu1 }
 0x158   :  { %v831_v12 = vpop.f32.mrf.mxu0 }
 0x159   :  { %v883_v20 = vadd.f32 %v831_v12, %v784_v40  ;;  %v881_v28 = vadd.f32 %v851_v27, %v782_v46 }
 0x15b   :  { %v899_v30 = vadd.f32 %v891_v13, %v881_v28  ;;  %v901_v33 = vadd.f32 %v896_v5, %v883_v20 }
 0x15c   :  { %v775_v36 = vpop.f32.mrf.mxu3 }
 0x15d   :  { %v905_v45 = vmax.f32 %v899_v30, 0.0  ;;  %v907_v31 = vmax.f32 %v901_v33, 0.0  ;;  %v783_v60 = vadd.f32 %v775_v36, %v684_v57 }
 0x15e   :  { %v755_v50 = vpop.f32.mrf.mxu2 }
 0x15f   :  { %911 = vst [vmem:[%s2737_s3 + $0x8] sm:$0xff] %v905_v45  ;;  %v785_v41 = vadd.f32 %v755_v50, %v686_v38  ;;  %v854_v39 = vpop.f32.mrf.mxu1 }
 0x160   :  { %913 = vst [vmem:[%s2737_s3 + $0x18] sm:$0xff] %v907_v31  ;;  %v2691_v0 = vpop.f32.mrf.mxu0 }
 0x161   :  { %v884_v44 = vadd.f32 %v854_v39, %v785_v41 }
 0x163   :  { %v902_v25 = vadd.f32 %v896_v5, %v884_v44 }
 0x164   :  { %v778_v53 = vpop.f32.mrf.mxu3 }
 0x165   :  { %v908_v6 = vmax.f32 %v902_v25, 0.0  ;;  %v786_v32 = vadd.f32 %v778_v53, %v687_v16 }
 0x166   :  { %v874_v49 = vpop.f32.mrf.mxu2 }
 0x167   :  { %914 = vst [vmem:[%s2737_s3 + $0x20] sm:$0xff] %v908_v6  ;;  %v882_v62 = vadd.f32 %v874_v49, %v783_v60  ;;  %v1012_v63 = vpop.f32.mrf.mxu1 }
 0x168   :  { %v992_v43 = vpop.f32.mrf.mxu0 }
 0x169   :  { %v900_v1 = vadd.f32 %v891_v13, %v882_v62 }
 0x16b   :  { %v906_v26 = vmax.f32 %v900_v1, 0.0 }
 0x16c   :  { %v966_v56 = vpop.f32.mrf.mxu3 }
 0x16d   :  { %912 = vst [vmem:[%s2737_s3 + $0x10] sm:$0xff] %v906_v26 }
 0x16e   :  { %v877_v48 = vpop.f32.mrf.mxu2 }
 0x16f   :  { %v885_v34 = vadd.f32 %v877_v48, %v786_v32  ;;  %v1015_v35 = vpop.f32.mrf.mxu1 }
 0x170   :  { %v1087_v9 = vpop.f32.mrf.mxu0 }
 0x171   :  { %v903_v2 = vadd.f32 %v896_v5, %v885_v34  ;;  %v1088_v3 = vadd.f32 %v1087_v9, %v1012_v63 }
 0x173   :  { %v909_v4 = vmax.f32 %v903_v2, 0.0  ;;  %v1777_v2 = vpop.permute.xlu1 %1776 }
 0x174   :  { %v969_v61 = vpop.f32.mrf.mxu3 }
 0x175   :  { %915 = vst [vmem:[%s2737_s3 + $0x28] sm:$0xff] %v909_v4 }
 0x176   :  { %v1041_v55 = vpop.f32.mrf.mxu2 }
 0x177   :  { %v1042_v8 = vadd.f32 %v1041_v55, %v966_v56  ;;  %v1132_v13 = vpop.f32.mrf.mxu1 }
 0x178   :  { %v1090_v52 = vpop.f32.mrf.mxu0 }
 0x179   :  { %v1091_v14 = vadd.f32 %v1090_v52, %v1015_v35  ;;  %v1184_v15 = vadd.f32 %v1132_v13, %v1042_v8 }
 0x17c   :  { %v1064_v59 = vpop.f32.mrf.mxu3 }
 0x17d   :  { %v1065_v37 = vadd.f32 %v1064_v59, %v2691_v0 }
 0x17e   :  { %v1044_v51 = vpop.f32.mrf.mxu2 }
 0x17f   :  { %v1045_v17 = vadd.f32 %v1044_v51, %v969_v61  ;;  %v1135_v18 = vpop.f32.mrf.mxu1 }
 0x180   :  { %v1229_v22 = vpop.f32.mrf.mxu0 }
 0x181   :  { %v1187_v10 = vadd.f32 %v1135_v18, %v1045_v17  ;;  %v1281_v19 = vadd.f32 %v1229_v22, %v1184_v15 }
 0x184   :  { %v1067_v11 = vpop.f32.mrf.mxu3 }
 0x185   :  { %v1068_v60 = vadd.f32 %v1067_v11, %v992_v43 }
 0x186   :  { %v1155_v23 = vpop.f32.mrf.mxu2 }
 0x187   :  { %v1252_v24 = vpop.f32.mrf.mxu1  ;;  %v1185_v57 = vadd.f32 %v1155_v23, %v1065_v37 }
 0x188   :  { %v1232_v40 = vpop.f32.mrf.mxu0 }
 0x189   :  { %v2709_v46 = vadd.f32 %v1232_v40, %v1187_v10  ;;  %v1282_v53 = vadd.f32 %v1252_v24, %v1185_v57  ;;  %v1782_v40 = vpop.permute.xlu2 %1781 }
 0x18c   :  { %v1178_v27 = vpop.f32.mrf.mxu3 }
 0x18d   :  { %v1186_v1 = vadd.f32 %v1178_v27, %v1088_v3 }
 0x18e   :  { %v1158_v12 = vpop.f32.mrf.mxu2 }
 0x18f   :  { %v1255_v5 = vpop.f32.mrf.mxu1  ;;  %v1188_v63 = vadd.f32 %v1158_v12, %v1068_v60 }
 0x190   :  { %v1349_v58 = vpop.f32.mrf.mxu0 }
 0x191   :  { %v1379_v6 = vadd.f32 %v1349_v58, %v1282_v53  ;;  %v1285_v56 = vadd.f32 %v1255_v5, %v1188_v63 }
 0x194   :  { %v1181_v20 = vpop.f32.mrf.mxu3 }
 0x195   :  { %v1189_v43 = vadd.f32 %v1181_v20, %v1091_v14 }
 0x196   :  { %v1275_v28 = vpop.f32.mrf.mxu2 }
 0x197   :  { %v1372_v29 = vpop.f32.mrf.mxu1  ;;  %v1283_v32 = vadd.f32 %v1275_v28, %v1186_v1 }
 0x198   :  { %v1352_v7 = vpop.f32.mrf.mxu0 }
 0x199   :  { %v1382_v0 = vadd.f32 %v1352_v7, %v1285_v56  ;;  %v1380_v4 = vadd.f32 %v1372_v29, %v1283_v32 }
 0x19c   :  { %v1326_v30 = vpop.f32.mrf.mxu3 }
 0x19d   :  { %v1378_v8 = vadd.f32 %v1326_v30, %v1281_v19 }
 0x19e   :  { %v1278_v33 = vpop.f32.mrf.mxu2 }
 0x19f   :  { %v1375_v36 = vpop.f32.mrf.mxu1  ;;  %v1286_v3 = vadd.f32 %v1278_v33, %v1189_v43 }
 0x1a0   :  { %v1469_v21 = vpop.f32.mrf.mxu0 }
 0x1a1   :  { %v1477_v13 = vadd.f32 %v1469_v21, %v1380_v4  ;;  %v1383_v14 = vadd.f32 %v1375_v36, %v1286_v3 }
 0x1a4   :  { %v1329_v38 = vpop.f32.mrf.mxu3 }
 0x1a5   :  { %v1381_v5 = vadd.f32 %v1329_v38, %v2709_v46 }
 0x1a6   :  { %v1423_v45 = vpop.f32.mrf.mxu2 }
 0x1a7   :  { %v1520_v31 = vpop.f32.mrf.mxu1  ;;  %v1475_v51 = vadd.f32 %v1423_v45, %v1378_v8 }
 0x1a8   :  { %v1472_v50 = vpop.f32.mrf.mxu0 }
 0x1a9   :  { %v1572_v19 = vadd.f32 %v1520_v31, %v1475_v51  ;;  %v1480_v58 = vadd.f32 %v1472_v50, %v1383_v14 }
 0x1ac   :  { %v1446_v41 = vpop.f32.mrf.mxu3 }
 0x1ad   :  { %v1476_v47 = vadd.f32 %v1446_v41, %v1379_v6 }
 0x1ae   :  { %v1426_v39 = vpop.f32.mrf.mxu2 }
 0x1af   :  { %v2712_v44 = vpop.f32.mrf.mxu1  ;;  %v1478_v7 = vadd.f32 %v1426_v39, %v1381_v5 }
 0x1b0   :  { %v1617_v42 = vpop.f32.mrf.mxu0 }
 0x1b1   :  { %v1669_v20 = vadd.f32 %v1617_v42, %v1572_v19  ;;  %v1575_v46 = vadd.f32 %v2712_v44, %v1478_v7 }
 0x1b4   :  { %v1449_v25 = vpop.f32.mrf.mxu3 }
 0x1b5   :  { %v1479_v61 = vadd.f32 %v1449_v25, %v1382_v0 }
 0x1b6   :  { %v1543_v54 = vpop.f32.mrf.mxu2 }
 0x1b7   :  { %v1640_v49 = vpop.f32.mrf.mxu1  ;;  %v1573_v16 = vadd.f32 %v1543_v54, %v1476_v47 }
 0x1b8   :  { %v1620_v62 = vpop.f32.mrf.mxu0 }
 0x1b9   :  { %v1670_v34 = vadd.f32 %v1640_v49, %v1573_v16  ;;  %v1672_v39 = vadd.f32 %v1620_v62, %v1575_v46 }
 0x1bc   :  { %v1566_v26 = vpop.f32.mrf.mxu3 }
 0x1bd   :  { %v1574_v17 = vadd.f32 %v1566_v26, %v1477_v13 }
 0x1be   :  { %v1546_v48 = vpop.f32.mrf.mxu2 }
 0x1bf   :  { %v1643_v35 = vpop.f32.mrf.mxu1  ;;  %v1576_v52 = vadd.f32 %v1546_v48, %v1479_v61 }
 0x1c0   :  { %v1737_v9 = vpop.f32.mrf.mxu0 }
 0x1c1   :  { %v1767_v55 = vadd.f32 %v1737_v9, %v1670_v34  ;;  %v1673_v10 = vadd.f32 %v1643_v35, %v1576_v52 }
 0x1c3   :  { %v1785_v15 = vadd.f32 %v1777_v2, %v1767_v55 }
 0x1c4   :  { %v1569_v59 = vpop.f32.mrf.mxu3 }
 0x1c5   :  { %v1791_v18 = vmax.f32 %v1785_v15, 0.0  ;;  %v1577_v33 = vadd.f32 %v1569_v59, %v1480_v58 }
 0x1c6   :  { %v1663_v22 = vpop.f32.mrf.mxu2 }
 0x1c7   :  { %1952 = vst [vmem:[%s2737_s3 + $0x38] sm:$0xff] %v1791_v18  ;;  %v1671_v11 = vadd.f32 %v1663_v22, %v1574_v17  ;;  %v1760_v23 = vpop.f32.mrf.mxu1 }
 0x1c8   :  { %v1740_v24 = vpop.f32.mrf.mxu0 }
 0x1c9   :  { %v1770_v27 = vadd.f32 %v1740_v24, %v1673_v10  ;;  %v1768_v12 = vadd.f32 %v1760_v23, %v1671_v11 }
 0x1cb   :  { %v1786_v28 = vadd.f32 %v1777_v2, %v1768_v12  ;;  %v1788_v29 = vadd.f32 %v1782_v40, %v1770_v27 }
 0x1cc   :  { %v1714_v30 = vpop.f32.mrf.mxu3 }
 0x1cd   :  { %v1792_v21 = vmax.f32 %v1786_v28, 0.0  ;;  %v1794_v45 = vmax.f32 %v1788_v29, 0.0  ;;  %v1766_v41 = vadd.f32 %v1714_v30, %v1669_v20 }
 0x1ce   :  { %v1666_v37 = vpop.f32.mrf.mxu2 }
 0x1cf   :  { %1953 = vst [vmem:[%s2737_s3 + $0x40] sm:$0xff] %v1792_v21  ;;  %v1784_v36 = vadd.f32 %v1777_v2, %v1766_v41  ;;  %v1674_v31 = vadd.f32 %v1666_v37, %v1577_v33  ;;  %v1763_v57 = vpop.f32.mrf.mxu1 }
 0x1d0   :  { %1955 = vst [vmem:[%s2737_s3 + $0x50] sm:$0xff] %v1794_v45 }
 0x1d1   :  { %v1790_v38 = vmax.f32 %v1784_v36, 0.0  ;;  %v1771_v50 = vadd.f32 %v1763_v57, %v1674_v31 }
 0x1d3   :  { %1951 = vst [vmem:[%s2737_s3 + $0x30] sm:$0xff] %v1790_v38  ;;  %v1789_v42 = vadd.f32 %v1782_v40, %v1771_v50 }
 0x1d4   :  { %v1717_v25 = vpop.f32.mrf.mxu3 }
 0x1d5   :  { %v1795_v53 = vmax.f32 %v1789_v42, 0.0  ;;  %v1769_v54 = vadd.f32 %v1717_v25, %v1672_v39 }
 0x1d7   :  { %1956 = vst [vmem:[%s2737_s3 + $0x58] sm:$0xff] %v1795_v53  ;;  %v1787_v60 = vadd.f32 %v1782_v40, %v1769_v54 }
 0x1d9   :  { %v1793_v6 = vmax.f32 %v1787_v60, 0.0 }
 0x1db   :  { %1954 = vst [vmem:[%s2737_s3 + $0x48] sm:$0xff] %v1793_v6 }

</bundles_post_ra>
